<compile_context>
chip_gen: v7x
topology: tpu7x:2x2x1
jax: 0.10.0
libtpu: 0.0.40
codegen_flags: <defaults>
</compile_context>

<pallas_src>
import jax
import jax.numpy as jnp
from jax import lax
from jax.experimental import pallas as pl
from jax.experimental.pallas import tpu as pltpu


def rgcn_kernel(node_ref, adj_ref, wcat_ref, relp_ref, out_ref, q_ref):
    # node_ref : [N, De]              (compute dtype)   grid-invariant per batch
    # adj_ref  : [R, Tn, N]           (compute dtype)   native layout row tile
    # wcat_ref : [De, R*Dout_pad]     (compute dtype)   grid-invariant (resident weights)
    # relp_ref : [R, Dout_pad]        (float32)         rel_proj[b, r] = rel[b, r] @ W_r[De:]
    # out_ref  : [Tn, Dout_pad]       (float32)
    # q_ref    : VMEM scratch [R, N, Dout_pad] (compute dtype), persists across grid steps
    n_rel, _, d_pad = q_ref.shape

    # Build Q once per batch element (row tile 0); scratch persists across row tiles.
    @pl.when(pl.program_id(1) == 0)
    def _build_q():
        # One wide MXU matmul instead of R narrow ones (K = De underfills the MXU).
        q_all = jnp.dot(node_ref[...], wcat_ref[...],
                        preferred_element_type=jnp.float32)          # [N, R*Dout_pad] f32
        for r in range(n_rel):                                       # R small, static unroll
            q_r = q_all[:, r * d_pad:(r + 1) * d_pad] + relp_ref[r:r + 1, :]
            q_ref[r] = q_r.astype(q_ref.dtype)                       # tile-aligned plane store

    # Relation-summed contraction on the native adj layout, f32 accumulation.
    acc = jnp.dot(adj_ref[0], q_ref[0], preferred_element_type=jnp.float32)
    for r in range(1, n_rel):
        acc += jnp.dot(adj_ref[r], q_ref[r], preferred_element_type=jnp.float32)
    out_ref[...] = acc                                               # [Tn, Dout_pad] f32


def _choose_row_tile(n_nodes, n_rel, itemsize, budget_bytes=20 << 20, cap=512):
    """Largest row tile (multiple of 8, divides N, <= cap) whose double-buffered adj
    block (2 * R * Tn * N * itemsize) fits the byte budget."""
    best = None
    for tn in range(8, min(n_nodes, cap) + 1, 8):
        if n_nodes % tn == 0 and 2 * n_rel * tn * n_nodes * itemsize <= budget_bytes:
            best = tn
    if best is None:
        best = n_nodes      # tiny / awkward N: block spans the full dimension
    return best


def rgcn_forward(node_features, relation_features, adj, weight_rt, bias, *,
                 use_bf16=True, row_tile=None):
    B, N, De = node_features.shape
    _, R, Dr = relation_features.shape
    Dout = weight_rt.shape[-1]
    assert weight_rt.shape == (R, De + Dr, Dout)
    assert adj.shape == (B, R, N, N)

    compute_dtype = jnp.bfloat16 if use_bf16 else jnp.float32
    c_item = jnp.dtype(compute_dtype).itemsize

    # Split the per-relation weight into the node half and the relation half.
    w_top = weight_rt[:, :De, :]                      # [R, De, Dout]
    w_bot = weight_rt[:, De:, :]                      # [R, Dr, Dout]

    # Tiny relation projection precomputed outside the kernel (rank-1 trick).
    rel_proj = jnp.einsum("brd,rdo->bro", relation_features, w_bot,
                          precision=lax.Precision.HIGHEST).astype(jnp.float32)  # [B, R, Dout]

    # Lane-dense output: pad Dout up to a multiple of 128, slice after the kernel.
    Dout_pad = 128 * ((Dout + 127) // 128)
    pad = Dout_pad - Dout
    if pad:
        w_top = jnp.pad(w_top, ((0, 0), (0, 0), (0, pad)))
        rel_proj = jnp.pad(rel_proj, ((0, 0), (0, 0), (0, pad)))

    # Fuse the R node-side weights along the output axis (tiny tensor, one-time cost):
    # W_cat[:, r*Dout_pad:(r+1)*Dout_pad] == W_top[r]  -> lane-aligned per-r slices.
    w_cat = jnp.transpose(w_top, (1, 0, 2)).reshape(De, R * Dout_pad).astype(compute_dtype)

    node_c = node_features.astype(compute_dtype)
    adj_c = adj.astype(compute_dtype)                 # native layout, no HBM relayout pass

    # Row tiling so the dominant adj operand fits VMEM and the pipeline has steps.
    if row_tile is None:
        row_tile = _choose_row_tile(N, R, c_item)
    assert N % row_tile == 0
    n_row_tiles = N // row_tile

    # Explicit VMEM budget (double-buffered blocks + scratch), capped for v7x's 64 MiB.
    needed = (2 * R * row_tile * N * c_item           # adj tile (double-buffered)
              + 2 * N * De * c_item                   # node
              + 2 * De * R * Dout_pad * c_item        # fused weights
              + 2 * R * Dout_pad * 4                  # rel_proj
              + 2 * row_tile * Dout_pad * 4           # out tile
              + R * N * Dout_pad * c_item)            # Q scratch
    vmem_limit = int(min(max(2 * needed, 32 << 20), 56 << 20))

    out_pad = pl.pallas_call(
        rgcn_kernel,
        out_shape=jax.ShapeDtypeStruct((B, N, Dout_pad), jnp.float32),
        grid_spec=pltpu.PrefetchScalarGridSpec(
            num_scalar_prefetch=0,
            grid=(B, n_row_tiles),
            in_specs=[
                pl.BlockSpec((None, N, De), lambda b, t: (b, 0, 0)),
                pl.BlockSpec((None, R, row_tile, N), lambda b, t: (b, 0, t, 0)),
                pl.BlockSpec((De, R * Dout_pad), lambda b, t: (0, 0)),   # grid-invariant
                pl.BlockSpec((None, R, Dout_pad), lambda b, t: (b, 0, 0)),
            ],
            out_specs=pl.BlockSpec((None, row_tile, Dout_pad), lambda b, t: (b, t, 0)),
            scratch_shapes=[pltpu.VMEM((R, N, Dout_pad), compute_dtype)],
        ),
        compiler_params=pltpu.CompilerParams(
            dimension_semantics=("parallel", "arbitrary"),
            vmem_limit_bytes=vmem_limit),
    )(node_c, adj_c, w_cat, rel_proj)

    # Bias added in the wrapper (fuses with the slice).
    return out_pad[..., :Dout] + bias


def reference_forward(node_features, relation_features, adj, weight_rt, bias):
    # Plain-JAX replica of the PyTorch forward, for a correctness check.
    B, N, De = node_features.shape
    _, R, Dr = relation_features.shape
    supports = []
    for r in range(R):
        rf = jnp.broadcast_to(relation_features[:, r:r + 1, :], (B, N, Dr))
        x = jnp.concatenate([node_features, rf], axis=-1)            # [B, N, De+Dr]
        supports.append(jnp.einsum("bij,bjk->bik", adj[:, r], x))
    supports = jnp.concatenate(supports, axis=-1)                    # [B, N, R*(De+Dr)]
    w_flat = weight_rt.reshape(R * (De + Dr), -1)                    # [R*(De+Dr), Dout]
    return supports @ w_flat + bias


if __name__ == "__main__":
    B, N, R = 2, 8, 4
    De, Dr, Dout = 16, 16, 32

    key = jax.random.PRNGKey(0)
    k1, k2, k3, k4 = jax.random.split(key, 4)

    node_features = jax.random.normal(k1, (B, N, De), dtype=jnp.float32)
    relation_features = jax.random.normal(k2, (B, R, Dr), dtype=jnp.float32)
    adj = jax.random.uniform(k3, (B, R, N, N), dtype=jnp.float32)

    # Xavier-uniform init of the Linear weight [Dout, R*(De+Dr)], bias = 0 (as in reset_parameters)
    fan_in = R * (De + Dr)
    fan_out = Dout
    bound = (6.0 / (fan_in + fan_out)) ** 0.5
    w_linear = jax.random.uniform(k4, (Dout, fan_in), dtype=jnp.float32,
                                  minval=-bound, maxval=bound)
    # transpose to [in, out] and split per relation: [R, De+Dr, Dout]
    weight_rt = w_linear.T.reshape(R, De + Dr, Dout)
    bias = jnp.zeros((Dout,), dtype=jnp.float32)

    ref = reference_forward(node_features, relation_features, adj, weight_rt, bias)

    # Exact-path check (f32 MXU operands).
    out_f32 = rgcn_forward(node_features, relation_features, adj, weight_rt, bias,
                           use_bf16=False)
    out_f32 = jax.block_until_ready(out_f32)
    assert out_f32.shape == (B, N, Dout)
    assert jnp.allclose(out_f32, ref, atol=1e-3, rtol=1e-3), "f32 path mismatch vs reference"

    # Fast path (bf16 MXU operands, f32 accumulation) — looser tolerance for bf16 rounding.
    out_bf16 = jax.block_until_ready(
        rgcn_forward(node_features, relation_features, adj, weight_rt, bias, use_bf16=True))
    assert out_bf16.shape == (B, N, Dout)
    assert jnp.allclose(out_bf16, ref, atol=1.5e-1, rtol=5e-2), "bf16 path mismatch vs reference"

    print("KERNEL_OK")
</pallas_src>

<mosaic_0001>
module attributes {stable_mosaic.version = 11 : i64} {
  func.func @rgcn_kernel(%arg0: i32, %arg1: i32, %arg2: memref<1x8x16xf32, #tpu.memory_space<vmem>>, %arg3: memref<1x4x8x8xf32, #tpu.memory_space<vmem>>, %arg4: memref<16x512xf32, #tpu.memory_space<vmem>>, %arg5: memref<1x4x128xf32, #tpu.memory_space<vmem>>, %arg6: memref<1x8x128xf32, #tpu.memory_space<vmem>>, %arg7: memref<4x8x128xf32, #tpu.memory_space<vmem>>) attributes {dimension_semantics = [#tpu.dimension_semantics<parallel>, #tpu.dimension_semantics<arbitrary>], iteration_bounds = array<i64: 2, 1>, scalar_prefetch = 0 : i64, scratch_operands = 1 : i64, tpu.core_type = #tpu.core_type<tc>, window_params = [{transform_indices = @transform_0, window_bounds = array<i64: 1, 8, 16>}, {transform_indices = @transform_1, window_bounds = array<i64: 1, 4, 8, 8>}, {pipeline_mode = #tpu.pipeline_mode<synchronous>, transform_indices = @transform_2, window_bounds = array<i64: 16, 512>}, {transform_indices = @transform_3, window_bounds = array<i64: 1, 4, 128>}, {transform_indices = @transform_4, window_bounds = array<i64: 1, 8, 128>}]} {
    %c0_i32 = arith.constant 0 : i32
    %0 = arith.cmpi eq, %arg1, %c0_i32 : i32
    %1 = arith.extui %0 : i1 to i32
    %c0_i32_0 = arith.constant 0 : i32
    %2 = arith.cmpi ne, %1, %c0_i32_0 : i32
    scf.if %2 {
      %c0_31 = arith.constant 0 : index
      %c0_32 = arith.constant 0 : index
      %c0_33 = arith.constant 0 : index
      %29 = vector.load %arg2[%c0_31, %c0_32, %c0_33] : memref<1x8x16xf32, #tpu.memory_space<vmem>>, vector<1x8x16xf32>
      %30 = vector.shape_cast %29 : vector<1x8x16xf32> to vector<8x16xf32>
      %c0_34 = arith.constant 0 : index
      %c0_35 = arith.constant 0 : index
      %31 = vector.load %arg4[%c0_34, %c0_35] : memref<16x512xf32, #tpu.memory_space<vmem>>, vector<16x512xf32>
      %cst_36 = arith.constant dense<0.000000e+00> : vector<8x512xf32>
      %32 = tpu.matmul %30, %31, %cst_36 {dimension_numbers = #tpu.dot_dimension_numbers<[1], [0], [0], [1], [0, 0, 1, 1], [], []>} : vector<8x16xf32>, vector<16x512xf32>, vector<8x512xf32> -> vector<8x512xf32>
      %33 = vector.extract_strided_slice %32 {offsets = [0, 0], sizes = [8, 128], strides = [1, 1]} : vector<8x512xf32> to vector<8x128xf32>
      %c0_37 = arith.constant 0 : index
      %c0_38 = arith.constant 0 : index
      %c0_39 = arith.constant 0 : index
      %34 = vector.load %arg5[%c0_37, %c0_38, %c0_39] : memref<1x4x128xf32, #tpu.memory_space<vmem>>, vector<1x1x128xf32>
      %35 = vector.shape_cast %34 : vector<1x1x128xf32> to vector<1x128xf32>
      %36 = vector.broadcast %35 : vector<1x128xf32> to vector<8x128xf32>
      %37 = arith.addf %33, %36 : vector<8x128xf32>
      %c0_40 = arith.constant 0 : index
      %c0_41 = arith.constant 0 : index
      %c0_42 = arith.constant 0 : index
      %38 = vector.load %arg7[%c0_40, %c0_41, %c0_42] : memref<4x8x128xf32, #tpu.memory_space<vmem>>, vector<1x8x128xf32>
      %39 = vector.shape_cast %38 : vector<1x8x128xf32> to vector<8x128xf32>
      %40 = vector.shape_cast %37 : vector<8x128xf32> to vector<1x8x128xf32>
      tpu.vector_store %arg7[%c0_40, %c0_41, %c0_42], %40 {strides = array<i32>} : memref<4x8x128xf32, #tpu.memory_space<vmem>>, vector<1x8x128xf32>,
      %41 = vector.extract_strided_slice %32 {offsets = [0, 128], sizes = [8, 128], strides = [1, 1]} : vector<8x512xf32> to vector<8x128xf32>
      %c0_43 = arith.constant 0 : index
      %c1_44 = arith.constant 1 : index
      %c0_45 = arith.constant 0 : index
      %42 = vector.load %arg5[%c0_43, %c1_44, %c0_45] : memref<1x4x128xf32, #tpu.memory_space<vmem>>, vector<1x1x128xf32>
      %43 = vector.shape_cast %42 : vector<1x1x128xf32> to vector<1x128xf32>
      %44 = vector.broadcast %43 : vector<1x128xf32> to vector<8x128xf32>
      %45 = arith.addf %41, %44 : vector<8x128xf32>
      %c1_46 = arith.constant 1 : index
      %c0_47 = arith.constant 0 : index
      %c0_48 = arith.constant 0 : index
      %46 = vector.load %arg7[%c1_46, %c0_47, %c0_48] : memref<4x8x128xf32, #tpu.memory_space<vmem>>, vector<1x8x128xf32>
      %47 = vector.shape_cast %46 : vector<1x8x128xf32> to vector<8x128xf32>
      %48 = vector.shape_cast %45 : vector<8x128xf32> to vector<1x8x128xf32>
      tpu.vector_store %arg7[%c1_46, %c0_47, %c0_48], %48 {strides = array<i32>} : memref<4x8x128xf32, #tpu.memory_space<vmem>>, vector<1x8x128xf32>,
      %49 = vector.extract_strided_slice %32 {offsets = [0, 256], sizes = [8, 128], strides = [1, 1]} : vector<8x512xf32> to vector<8x128xf32>
      %c0_49 = arith.constant 0 : index
      %c2_50 = arith.constant 2 : index
      %c0_51 = arith.constant 0 : index
      %50 = vector.load %arg5[%c0_49, %c2_50, %c0_51] : memref<1x4x128xf32, #tpu.memory_space<vmem>>, vector<1x1x128xf32>
      %51 = vector.shape_cast %50 : vector<1x1x128xf32> to vector<1x128xf32>
      %52 = vector.broadcast %51 : vector<1x128xf32> to vector<8x128xf32>
      %53 = arith.addf %49, %52 : vector<8x128xf32>
      %c2_52 = arith.constant 2 : index
      %c0_53 = arith.constant 0 : index
      %c0_54 = arith.constant 0 : index
      %54 = vector.load %arg7[%c2_52, %c0_53, %c0_54] : memref<4x8x128xf32, #tpu.memory_space<vmem>>, vector<1x8x128xf32>
      %55 = vector.shape_cast %54 : vector<1x8x128xf32> to vector<8x128xf32>
      %56 = vector.shape_cast %53 : vector<8x128xf32> to vector<1x8x128xf32>
      tpu.vector_store %arg7[%c2_52, %c0_53, %c0_54], %56 {strides = array<i32>} : memref<4x8x128xf32, #tpu.memory_space<vmem>>, vector<1x8x128xf32>,
      %57 = vector.extract_strided_slice %32 {offsets = [0, 384], sizes = [8, 128], strides = [1, 1]} : vector<8x512xf32> to vector<8x128xf32>
      %c0_55 = arith.constant 0 : index
      %c3_56 = arith.constant 3 : index
      %c0_57 = arith.constant 0 : index
      %58 = vector.load %arg5[%c0_55, %c3_56, %c0_57] : memref<1x4x128xf32, #tpu.memory_space<vmem>>, vector<1x1x128xf32>
      %59 = vector.shape_cast %58 : vector<1x1x128xf32> to vector<1x128xf32>
      %60 = vector.broadcast %59 : vector<1x128xf32> to vector<8x128xf32>
      %61 = arith.addf %57, %60 : vector<8x128xf32>
      %c3_58 = arith.constant 3 : index
      %c0_59 = arith.constant 0 : index
      %c0_60 = arith.constant 0 : index
      %62 = vector.load %arg7[%c3_58, %c0_59, %c0_60] : memref<4x8x128xf32, #tpu.memory_space<vmem>>, vector<1x8x128xf32>
      %63 = vector.shape_cast %62 : vector<1x8x128xf32> to vector<8x128xf32>
      %64 = vector.shape_cast %61 : vector<8x128xf32> to vector<1x8x128xf32>
      tpu.vector_store %arg7[%c3_58, %c0_59, %c0_60], %64 {strides = array<i32>} : memref<4x8x128xf32, #tpu.memory_space<vmem>>, vector<1x8x128xf32>,
    } else {
    }
    %c0 = arith.constant 0 : index
    %c0_1 = arith.constant 0 : index
    %c0_2 = arith.constant 0 : index
    %c0_3 = arith.constant 0 : index
    %3 = vector.load %arg3[%c0, %c0_1, %c0_2, %c0_3] : memref<1x4x8x8xf32, #tpu.memory_space<vmem>>, vector<1x1x8x8xf32>
    %4 = vector.shape_cast %3 : vector<1x1x8x8xf32> to vector<8x8xf32>
    %c0_4 = arith.constant 0 : index
    %c0_5 = arith.constant 0 : index
    %c0_6 = arith.constant 0 : index
    %5 = vector.load %arg7[%c0_4, %c0_5, %c0_6] : memref<4x8x128xf32, #tpu.memory_space<vmem>>, vector<1x8x128xf32>
    %6 = vector.shape_cast %5 : vector<1x8x128xf32> to vector<8x128xf32>
    %cst = arith.constant dense<0.000000e+00> : vector<8x128xf32>
    %7 = tpu.matmul %4, %6, %cst {dimension_numbers = #tpu.dot_dimension_numbers<[1], [0], [0], [1], [0, 0, 1, 1], [], []>} : vector<8x8xf32>, vector<8x128xf32>, vector<8x128xf32> -> vector<8x128xf32>
    %c0_7 = arith.constant 0 : index
    %c1 = arith.constant 1 : index
    %c0_8 = arith.constant 0 : index
    %c0_9 = arith.constant 0 : index
    %8 = vector.load %arg3[%c0_7, %c1, %c0_8, %c0_9] : memref<1x4x8x8xf32, #tpu.memory_space<vmem>>, vector<1x1x8x8xf32>
    %9 = vector.shape_cast %8 : vector<1x1x8x8xf32> to vector<8x8xf32>
    %c1_10 = arith.constant 1 : index
    %c0_11 = arith.constant 0 : index
    %c0_12 = arith.constant 0 : index
    %10 = vector.load %arg7[%c1_10, %c0_11, %c0_12] : memref<4x8x128xf32, #tpu.memory_space<vmem>>, vector<1x8x128xf32>
    %11 = vector.shape_cast %10 : vector<1x8x128xf32> to vector<8x128xf32>
    %cst_13 = arith.constant dense<0.000000e+00> : vector<8x128xf32>
    %12 = tpu.matmul %9, %11, %cst_13 {dimension_numbers = #tpu.dot_dimension_numbers<[1], [0], [0], [1], [0, 0, 1, 1], [], []>} : vector<8x8xf32>, vector<8x128xf32>, vector<8x128xf32> -> vector<8x128xf32>
    %13 = arith.addf %7, %12 : vector<8x128xf32>
    %c0_14 = arith.constant 0 : index
    %c2 = arith.constant 2 : index
    %c0_15 = arith.constant 0 : index
    %c0_16 = arith.constant 0 : index
    %14 = vector.load %arg3[%c0_14, %c2, %c0_15, %c0_16] : memref<1x4x8x8xf32, #tpu.memory_space<vmem>>, vector<1x1x8x8xf32>
    %15 = vector.shape_cast %14 : vector<1x1x8x8xf32> to vector<8x8xf32>
    %c2_17 = arith.constant 2 : index
    %c0_18 = arith.constant 0 : index
    %c0_19 = arith.constant 0 : index
    %16 = vector.load %arg7[%c2_17, %c0_18, %c0_19] : memref<4x8x128xf32, #tpu.memory_space<vmem>>, vector<1x8x128xf32>
    %17 = vector.shape_cast %16 : vector<1x8x128xf32> to vector<8x128xf32>
    %cst_20 = arith.constant dense<0.000000e+00> : vector<8x128xf32>
    %18 = tpu.matmul %15, %17, %cst_20 {dimension_numbers = #tpu.dot_dimension_numbers<[1], [0], [0], [1], [0, 0, 1, 1], [], []>} : vector<8x8xf32>, vector<8x128xf32>, vector<8x128xf32> -> vector<8x128xf32>
    %19 = arith.addf %13, %18 : vector<8x128xf32>
    %c0_21 = arith.constant 0 : index
    %c3 = arith.constant 3 : index
    %c0_22 = arith.constant 0 : index
    %c0_23 = arith.constant 0 : index
    %20 = vector.load %arg3[%c0_21, %c3, %c0_22, %c0_23] : memref<1x4x8x8xf32, #tpu.memory_space<vmem>>, vector<1x1x8x8xf32>
    %21 = vector.shape_cast %20 : vector<1x1x8x8xf32> to vector<8x8xf32>
    %c3_24 = arith.constant 3 : index
    %c0_25 = arith.constant 0 : index
    %c0_26 = arith.constant 0 : index
    %22 = vector.load %arg7[%c3_24, %c0_25, %c0_26] : memref<4x8x128xf32, #tpu.memory_space<vmem>>, vector<1x8x128xf32>
    %23 = vector.shape_cast %22 : vector<1x8x128xf32> to vector<8x128xf32>
    %cst_27 = arith.constant dense<0.000000e+00> : vector<8x128xf32>
    %24 = tpu.matmul %21, %23, %cst_27 {dimension_numbers = #tpu.dot_dimension_numbers<[1], [0], [0], [1], [0, 0, 1, 1], [], []>} : vector<8x8xf32>, vector<8x128xf32>, vector<8x128xf32> -> vector<8x128xf32>
    %25 = arith.addf %19, %24 : vector<8x128xf32>
    %c0_28 = arith.constant 0 : index
    %c0_29 = arith.constant 0 : index
    %c0_30 = arith.constant 0 : index
    %26 = vector.load %arg6[%c0_28, %c0_29, %c0_30] : memref<1x8x128xf32, #tpu.memory_space<vmem>>, vector<1x8x128xf32>
    %27 = vector.shape_cast %26 : vector<1x8x128xf32> to vector<8x128xf32>
    %28 = vector.shape_cast %25 : vector<8x128xf32> to vector<1x8x128xf32>
    tpu.vector_store %arg6[%c0_28, %c0_29, %c0_30], %28 {strides = array<i32>} : memref<1x8x128xf32, #tpu.memory_space<vmem>>, vector<1x8x128xf32>,
    return
  }
  func.func @transform_0(%arg0: i32, %arg1: i32) -> (i32, i32, i32) {
    %c0_i32 = arith.constant 0 : i32
    %c0_i32_0 = arith.constant 0 : i32
    %c0_i32_1 = arith.constant 0 : i32
    return %arg0, %c0_i32, %c0_i32_0 : i32, i32, i32
  }
  func.func @transform_1(%arg0: i32, %arg1: i32) -> (i32, i32, i32, i32) {
    %c0_i32 = arith.constant 0 : i32
    %c0_i32_0 = arith.constant 0 : i32
    %c0_i32_1 = arith.constant 0 : i32
    return %arg0, %c0_i32, %arg1, %c0_i32_0 : i32, i32, i32, i32
  }
  func.func @transform_2(%arg0: i32, %arg1: i32) -> (i32, i32) {
    %c0_i32 = arith.constant 0 : i32
    %c0_i32_0 = arith.constant 0 : i32
    %c0_i32_1 = arith.constant 0 : i32
    return %c0_i32, %c0_i32_0 : i32, i32
  }
  func.func @transform_3(%arg0: i32, %arg1: i32) -> (i32, i32, i32) {
    %c0_i32 = arith.constant 0 : i32
    %c0_i32_0 = arith.constant 0 : i32
    %c0_i32_1 = arith.constant 0 : i32
    return %arg0, %c0_i32, %c0_i32_0 : i32, i32, i32
  }
  func.func @transform_4(%arg0: i32, %arg1: i32) -> (i32, i32, i32) {
    %c0_i32 = arith.constant 0 : i32
    %c0_i32_0 = arith.constant 0 : i32
    return %arg0, %arg1, %c0_i32 : i32, i32, i32
  }
}

</mosaic_0001>

<bundles_post_ra>
// kernel: tpu_custom_call.1
= control target key start
LH: loop header
LB: loop body
LE: loop exit
PB: predicated region body
PF: predicated region fallthrough
CT: control target
= control target key end

     0   :  { %s1598_s0 = inlined_call_operand.hbm [shape: f32[2,8,16], index: 0, kind: input, shape index: {}]   ;;  %s1599_s1 = inlined_call_operand.hbm [shape: f32[2,4,8,8], index: 1, kind: input, shape index: {}]   ;;  %s1600_s2 = inlined_call_operand.hbm [shape: f32[16,512], index: 2, kind: input, shape index: {}]   ;;  %s1601_s3 = inlined_call_operand.vmem [shape: f32[2,4,128], index: 3, kind: input, shape index: {}]   ;;  %s1602_s4 = inlined_call_operand.hbm [shape: f32[2,8,128], index: 4, kind: output, shape index: {}]  }
   0x1   :  { %1606 = sst [smem:[#allocation14_spill]] %s1598_s0 }
   0x2   :  { %1607 = sst [smem:[#allocation15_spill]] %s1600_s2 }
   0x3   :  { %9 = vsyncpa [#allocation4], 0 }
   0x4   :  { %11 = vsyncpa [#allocation4 + $0x1], 0 }
   0x5   :  { %12 = vsyncpa [#allocation7], 0 }
   0x6   :  { %14 = vsyncpa [#allocation7 + $0x1], 0 }
   0x7   :  { %15 = vsyncpa [#allocation5], 0 }
   0x8   :  { %17 = vsyncpa [#allocation5 + $0x1], 0  ;;  %s1315_s15 = smov 0   ;;  %s1317_s16 = smov 0  }
   0x9   :  { %s1319_s17 = smov 0   ;;  %s1321_s18 = smov 0  }
   0xa   :  { %s1323_s19 = smov 0   ;;  %s1325_s20 = smov 0  }
   0xb LB: > { %s1346_s21 = sadd.s32 4294967295, %s1278_s20   ;;  %s942_s22 = sadd.s32 4294967294, %s1278_s20   ;;  %s1278_s20 = sphi %s1325_s20, %s23_s20   ;;  %s1274_s19 = sphi %s1323_s19, %s1629_s19   ;;  %s1270_s18 = sphi %s1321_s18, %s1628_s18   ;;  %s1266_s17 = sphi %s1319_s17, %s1627_s17   ;;  %s1262_s16 = sphi %s1317_s16, %s1626_s16   ;;  %s1258_s15 = sphi %s1315_s15, %s1625_s15  }
   0xc   : > { %p55_p0 = scmp.ne.s32.totalorder %s1262_s16, %s1258_s15  ;;  %p1603_p1 = scmp.eq.s32.totalorder %s1346_s21, 0 }
   0xd   : > { %p162_p3 = scmp.eq.s32.totalorder %s942_s22, 1  ;;  %p943_p5 = scmp.ge.s32.totalorder %s1278_s20, 1 }
   0xe   : > { %p1355_p4 = por %p1603_p1, %p55_p0  ;;  %p169_p7 = scmp.lt.s32.totalorder %s1278_s20, 3 }
   0xf   : > { %p1360_p6 = por %p162_p3, %p55_p0  ;;  %s1280_s26 = smov [#allocation8]  }
  0x10   : > { %s1608_s23 = scalar_select %p1355_p4, 1, 0 }
  0x11   : > { %s1609_s24 = scalar_select %p1360_p6, 1, 0 }
  0x12   : > { %p1365_p8 = pnand %p943_p5, %p169_p7  ;;  %s181_s27 = sshll.u32 %s1280_s26, 4  ;;  %s182_s27 = int_to_ptr.vmem [resolvable:$true] %s181_s27 }
  0x13   : > { %s35_s29 = sadd.s32 1, %s1274_s19  ;;  %s1612_s2 = sld [smem:[#allocation15_spill]] }
  0x14   : > { %s1610_s25 = scalar_select %p1365_p8, 1, 0 }
  0x15   : > { %p1026_p9 = pneg %p1365_p8 }
  0x17   : > { %p1374_p11 = pnand %p1026_p9, %p1603_p1 }
  0x19   : > { %s1100_s6 = scalar_lea.hbm %s1612_s2, 1024  ;;  %p1102_p13 = pneg %p1374_p11 }
  0x1a   : > { %p1101_p12 = scmp.ne.s32.totalorder %s1612_s2, %s1100_s6  ;;  %p1107_p5 = scmp.lt.u32.totalorder %s1100_s6, %s1612_s2 }
  0x1c   : > { %p1103_p0 = pnand %p1102_p13, %p1101_p12 }
  0x1e   : > { %p1104_p3 = pneg %p1103_p0 }
  0x20   : > { %p1109_p7 = pnand %p1107_p5, %p1104_p3 }
  0x22   : > { %1112 = shalt.err (!%p1109_p7)
}
  0x23   : > { %s1113_s11 = scalar_lea.vmem %s182_s27, 1024  ;;  %p1121_p2 = scmp.lt.s32.totalorder %s182_s27, %s182_s27 }
  0x24   : > { %p1114_p9 = scmp.ne.s32.totalorder %s182_s27, %s1113_s11  ;;  %p1122_p6 = scmp.lt.s32.totalorder %s1113_s11, %s1113_s11 }
  0x26   : > { %p1116_p10 = pnand %p1114_p9, %p1102_p13  ;;  %p1123_p4 = por %p1122_p6, %p1121_p2 }
  0x28   : > { %p1117_p1 = pneg %p1116_p10 }
  0x2a   : > { %p1124_p8 = pnand %p1123_p4, %p1117_p1 }
  0x2c   : > { %1127 = shalt.err (!%p1124_p8)
}
  0x2d   : > { %s1281_s12 = smov 512   ;;  %s1282_s13 = smov 32  }
  0x2e   : > { %1029 = dma.hbm_to_vmem [thread:$0]  (!%p1374_p11), %s1612_s2, 1024, %s182_s27, [#allocation7], %s1281_s12, %s1281_s12, %s1282_s13  }
  0x2f   : > { %p37_p1 = scmp.ge.s32.totalorder %s35_s29, 2  ;;  %s42_s26 = sadd.s32 1, %s1266_s17 }
  0x30   : > { %p49_p2 = scmp.ne.s32.totalorder %s1266_s17, %s1262_s16  ;;  %p50_p4 = scmp.eq.s32.totalorder %s1278_s20, 0 }
  0x31   : > { %s1631_s29 = smov (%p37_p1, %s35_s29), 0  ;;  %p1614_p8 = scmp.eq.s32.totalorder %s1346_s21, 1 }
  0x32   : > { %p1401_p6 = por %p50_p4, %p49_p2  ;;  %s39_s5 = ssub.s32 %s1274_s19, %s1631_s29 }
  0x33   : > { %p1407_p10 = por %p1614_p8, %p49_p2  ;;  %p1042_p11 = scmp.lt.s32.totalorder %s1278_s20, 2 }
  0x34   : > { %p40_p12 = scmp.eq.s32.totalorder %s39_s5, 0  ;;  %s1415_s27 = sand.u32 1, %s1266_s17  }
  0x35   : > { %s946_s6 = sshll.u32 %s1415_s27, 3  ;;  %s947_s8 = sshll.u32 %s1274_s19, 7 }
  0x36   : > { %s1419_s7 = scalar_select %p40_p12, %s1266_s17, %s42_s26  }
  0x37   : > { %s1616_s0 = sld [smem:[#allocation14_spill]]  ;;  %s199_s12 = scalar_lea.vmem [#allocation3], %s946_s6 }
  0x38   : > { %s206_s13 = sshll.u32 %s199_s12, 4  ;;  %p1431_p13 = pnand %p1042_p11, %p1401_p6  ;;  %s1427_s13 = int_to_ptr.vmem [resolvable:$true] %s206_s13 }
  0x39   : > { %s948_s22 = sshll.u32 %s1415_s27, 5  ;;  %s196_s5 = scalar_lea.sflag [#allocation4], %s1415_s27 }
  0x3a   : > { %p1130_p3 = pneg %p1431_p13 }
  0x3d   : > { %s1425_s11 = scalar_lea.hbm %s1616_s0, %s947_s8  ;;  %s1133_s30 = scalar_lea.hbm %s1616_s0, 256 }
  0x3e   : > { %s1128_s8 = scalar_lea.hbm %s1425_s11, 128  ;;  %p1134_p9 = scmp.lt.u32.totalorder %s1425_s11, %s1616_s0 }
  0x3f   : > { %p1129_p0 = scmp.ne.s32.totalorder %s1425_s11, %s1128_s8  ;;  %p1135_p1 = scmp.lt.u32.totalorder %s1133_s30, %s1128_s8 }
  0x40   : > { %p1137_p4 = scmp.lt.u32.totalorder %s1128_s8, %s1425_s11 }
  0x41   : > { %p1131_p5 = pnand %p1130_p3, %p1129_p0  ;;  %p1136_p2 = por %p1135_p1, %p1134_p9 }
  0x43   : > { %p1132_p7 = pneg %p1131_p5  ;;  %p1138_p6 = por %p1137_p4, %p1136_p2 }
  0x45   : > { %p1139_p8 = pnand %p1138_p6, %p1132_p7 }
  0x47   : > { %1142 = shalt.err (!%p1139_p8)
}
  0x48   : > { %s1143_s26 = scalar_lea.vmem %s1427_s13, 128  ;;  %s1283_s6 = smov [#allocation3]  }
  0x49   : > { %p1144_p11 = scmp.ne.s32.totalorder %s1427_s13, %s1143_s26  ;;  %s1148_s9 = sshll.u32 %s1283_s6, 4  ;;  %s1149_s9 = int_to_ptr.vmem [resolvable:$false] %s1148_s9 }
  0x4a   : > { %s1150_s10 = scalar_lea.vmem %s1149_s9, 256  ;;  %p1151_p5 = scmp.lt.s32.totalorder %s1427_s13, %s1149_s9 }
  0x4b   : > { %p1146_p12 = pnand %p1144_p11, %p1130_p3  ;;  %p1152_p9 = scmp.lt.s32.totalorder %s1150_s10, %s1143_s26 }
  0x4d   : > { %p1147_p0 = pneg %p1146_p12  ;;  %p1153_p1 = por %p1152_p9, %p1151_p5 }
  0x4f   : > { %p1154_p2 = pnand %p1153_p1, %p1147_p0 }
  0x51   : > { %1157 = shalt.err (!%p1154_p2)
}
  0x52   : > { %1033 = dma.hbm_to_vmem [thread:$0]  (!%p1431_p13), %s1425_s11, 128, %s1427_s13, %s196_s5  }
  0x53   : > { %s217_s8 = scalar_lea.vmem [#allocation6], %s948_s22  ;;  %s213_s12 = sand.u32 1, %s1278_s20  }
  0x54   : > { %s225_s30 = sshll.u32 %s217_s8, 4  ;;  %s1618_s6 = sshll.u32 %s1274_s19, 9  ;;  %s1466_s30 = int_to_ptr.vmem [resolvable:$true] %s225_s30 }
  0x55   : > { %s1473_s10 = scalar_lea.hbm %s1599_s1, %s1618_s6  ;;  %s1475_s0 = scalar_lea.sflag [#allocation7], %s213_s12 }
  0x56   : > { %s1158_s2 = scalar_lea.hbm %s1473_s10, 512  ;;  %s1163_s13 = scalar_lea.hbm %s1599_s1, 1024 }
  0x57   : > { %p1159_p7 = scmp.ne.s32.totalorder %s1473_s10, %s1158_s2  ;;  %p1164_p8 = scmp.lt.u32.totalorder %s1473_s10, %s1599_s1 }
  0x58   : > { %p1165_p11 = scmp.lt.u32.totalorder %s1163_s13, %s1158_s2  ;;  %p1167_p0 = scmp.lt.u32.totalorder %s1158_s2, %s1473_s10 }
  0x59   : > { %p1161_p4 = pnand %p1159_p7, %p1130_p3 }
  0x5a   : > { %p1166_p12 = por %p1165_p11, %p1164_p8 }
  0x5b   : > { %p1162_p6 = pneg %p1161_p4 }
  0x5c   : > { %p1168_p5 = por %p1167_p0, %p1166_p12 }
  0x5e   : > { %p1169_p9 = pnand %p1168_p5, %p1162_p6 }
  0x60   : > { %1172 = shalt.err (!%p1169_p9)
}
  0x61   : > { %s1173_s8 = scalar_lea.vmem %s1466_s30, 512  ;;  %s1284_s12 = smov [#allocation6]  }
  0x62   : > { %p1174_p1 = scmp.ne.s32.totalorder %s1466_s30, %s1173_s8  ;;  %s1178_s6 = sshll.u32 %s1284_s12, 4  ;;  %s1179_s6 = int_to_ptr.vmem [resolvable:$false] %s1178_s6 }
  0x63   : > { %s1180_s26 = scalar_lea.vmem %s1179_s6, 1024  ;;  %p1181_p4 = scmp.lt.s32.totalorder %s1466_s30, %s1179_s6 }
  0x64   : > { %p1176_p2 = pnand %p1174_p1, %p1130_p3  ;;  %p1182_p8 = scmp.lt.s32.totalorder %s1180_s26, %s1173_s8 }
  0x66   : > { %p1177_p7 = pneg %p1176_p2  ;;  %p1183_p11 = por %p1182_p8, %p1181_p4 }
  0x68   : > { %p1184_p12 = pnand %p1183_p11, %p1177_p7 }
  0x6a   : > { %1187 = shalt.err (!%p1184_p12)
}
  0x6b   : > { %s1285_s2 = smov 128   ;;  %s1286_s9 = smov 8  }
  0x6c   : > { %1036 = dma.hbm_to_vmem [thread:$0]  (!%p1431_p13), %s1473_s10, 512, %s1466_s30, %s1475_s0, %s1285_s2, %s1285_s2, %s1286_s9  }
  0x6d   : > { %p1619_p3 = scmp.ne.s32.totalorder %s1610_s25, 0 }
  0x6e   : > { %s1504_s27 = sand.u32 (!%p1619_p3), 1, %s1262_s16   ;;  %p1620_p6 = scmp.ne.s32.totalorder (!%p1619_p3), %s1608_s23, 0 }
  0x6f   : > { %244 = sbr.rel (%p1619_p3) target bundleno = 592 (0x250), region = 36  ;;  %s952_s11 = sshll.u32 (!%p1619_p3), %s1504_s27, 3 }
  0x70   : > { %s247_s13 = scalar_lea.sflag (!%p1619_p3), [#allocation4], %s1504_s27  ;;  %s250_s22 = scalar_lea.vmem (!%p1619_p3), [#allocation3], %s952_s11 }
  0x76   : > { %1241 = dma.done.wait (%p1620_p6), %s247_s13, 128  }
  0x77   : > { %1243 = vsyncadd (%p1620_p6), %s247_s13, 4294967168  ;;  %s255_s0 = sand.u32 1, %s1346_s21   ;;  %s953_s25 = sshll.u32 %s1504_s27, 5 }
  0x78   : > { %s256_s14 = scalar_lea.sflag [#allocation7], %s255_s0  ;;  %s1516_s30 = scalar_lea.vmem [#allocation6], %s953_s25 }
  0x79   : > { %1245 = dma.done.wait (%p1620_p6), %s256_s14, 512  }
  0x7a   : > { %1247 = vsyncadd (%p1620_p6), %s256_s14, 4294966784  ;;  %p1621_p13 = scmp.eq.s32.totalorder %s1346_s21, 0 }
  0x7c   : > { %1249 = dma.done.wait (%p1621_p13), [#allocation7], 1024   ;;  %p1622_p0 = pmov %p1621_p13 }
  0x7d   : > { %v1287_v0 = vmov 0.0   ;;  %v307_v1 = vld [vmem:[#allocation8 + $0x8] sm:$0xff]  ;;  %v306_v3 = vld [vmem:[#allocation8] sm:$0xff]  ;;  %v309_v6 = vld [vmem:[#allocation8 + $0x18] sm:$0xff]  ;;  %vm314_vm0 = vcmask 130048   ;;  %vm1288_vm1 = vmmov 0  }
  0x7e   : > { %1251 = vsyncadd (%p1622_p0), [#allocation7], 4294966272  ;;  %382 = vmatprep.mubr.f32.mxu1 %v1287_v0  ;;  %988 = vmatprep.subr.mxu0 %v1287_v0  ;;  %v311_v2 = vld [vmem:[#allocation8 + $0x28] sm:$0xff]  ;;  %v310_v5 = vld [vmem:[#allocation8 + $0x20] sm:$0xff]  ;;  %p297_p5 = scmp.lt.s32.totalorder %s1270_s18, 1  ;;  %vm497_vm2 = vcmask 64512  }
  0x7f   : > { %v1003_v4 = vpack.c.bf16 %v311_v2, %v307_v1  ;;  %v1005_v7 = vpack.c.bf16 %v310_v5, %v306_v3  ;;  %v313_v8 = vld [vmem:[#allocation8 + $0x38] sm:$0xff]  ;;  %v308_v9 = vld [vmem:[#allocation8 + $0x10] sm:$0xff]  ;;  %990 = vmatprep.mubr.msk.f32.mxu0 %vm1288_vm1, %v1287_v0  ;;  %v491_v19 = vld [vmem:[%s1516_s30] sm:$0xff]  ;;  %s971_s12 = sshll.u32 %s1270_s18, 7  ;;  %s296_s6 = scalar_lea.vmem [#allocation9], %s952_s11 }
  0x80   : > { %v312_v10 = vld [vmem:[#allocation8 + $0x30] sm:$0xff]  ;;  %v1007_v11 = vpack.c.bf16 %v313_v8, %v309_v6  ;;  %s298_s21 = scalar_select %p297_p5, %s1270_s18, 1  ;;  %v963_v22 = vld [vmem:[%s1516_s30 + $0x8] sm:$0xff]  ;;  %v968_v29 = vld [vmem:[%s1516_s30 + $0x18] sm:$0xff] }
  0x81   : > { %1004 = vmatprep.subr.bf16.mxu1 %v1003_v4  ;;  %v305_v12 = vld [vmem:[%s250_s22] sm:$0xff]  ;;  %v1009_v13 = vpack.c.bf16 %v312_v10, %v308_v9  ;;  %s816_s26 = sshll.u32 %s296_s6, 4  ;;  %s1549_s13 = scalar_lea.hbm %s1602_s4, %s971_s12  ;;  %s1551_s26 = int_to_ptr.vmem [resolvable:$true] %s816_s26 }
  0x82   : > { %1006 = vmatpush1.bf16.msra.mxu1 %v1005_v7  ;;  %s956_s23 = sshll.u32 %s298_s21, 2  ;;  %v966_v28 = vld [vmem:[%s1516_s30 + $0x10] sm:$0xff]  ;;  %s802_s22 = scalar_lea.sflag [#allocation5], %s1504_s27 }
  0x83   : > { %1008 = vmatprep.subr.bf16.mxu1 %v1007_v11  ;;  %s300_s8 = scalar_lea.vmem %s1601_s3, %s956_s23  ;;  %s1188_s0 = scalar_lea.vmem %s1551_s26, 128 }
  0x84   : > { %v959_v14 = vld [vmem:[%s300_s8] ss:$0 sm:$0xff]  ;;  %v960_v15 = vld [vmem:[%s300_s8 + $0x1] ss:$0 sm:$0xff]  ;;  %v961_v21 = vld [vmem:[%s300_s8 + $0x2] ss:$0 sm:$0xff]  ;;  %p1189_p9 = scmp.ne.s32.totalorder %s1551_s26, %s1188_s0 }
  0x85   : > { %957 = vmatmul.mubr.msk.f32.vlgmr.msra.gmra.mrb[0].mxu1 %vm314_vm0, %v305_v12  ;;  %v962_v26 = vld [vmem:[%s300_s8 + $0x3] ss:$0 sm:$0xff]  ;;  %s1289_s18 = smov [#allocation9]  }
  0x86   : > { %1010 = vmatpush1.bf16.msra.mxu1 %v1009_v13  ;;  %453 = vmatprep.mubr.f32.mxu1 %v1287_v0  ;;  %p1190_p1 = pnand %p1189_p9, %p1407_p10  ;;  %s1192_s11 = sshll.u32 %s1289_s18, 4  ;;  %s1193_s11 = int_to_ptr.vmem [resolvable:$false] %s1192_s11 }
  0x87   : > { %983 = vmatprep.subr.mxu1 %v1287_v0  ;;  %s1194_s25 = scalar_lea.vmem %s1193_s11, 256  ;;  %p1195_p7 = scmp.lt.s32.totalorder %s1551_s26, %s1193_s11 }
  0x88   : > { %p1191_p2 = pneg %p1190_p1  ;;  %p1196_p4 = scmp.lt.s32.totalorder %s1194_s25, %s1188_s0 }
  0x89   : > { %958 = vmatmul.mubr.msk.f32.vlgmr.msra.gmra.mrb[2].mxu1 %vm314_vm0, %v305_v12 }
  0x8a   : > { %985 = vmatprep.mubr.msk.f32.mxu1 %vm1288_vm1, %v1287_v0  ;;  %p1197_p8 = por %p1196_p4, %p1195_p7 }
  0x8c   : > { %p1198_p11 = pnand %p1197_p8, %p1191_p2 }
 0x158   : > { %v384_v16 = vpop.f32.mrb[0].mxu1 }
 0x159   : > { %v465_v17 = vadd.f32 %v959_v14, %v384_v16  ;;  %v386_v18 = vpop.f32.mrb[1].mxu1 }
 0x15a   : > { %v472_v20 = vadd.f32 %v960_v15, %v386_v18 }
 0x15b   : > { %989 = vmatpush3.msra.mxu0 %v465_v17 }
 0x15c   : > { %v455_v23 = vpop.f32.mrb[2].mxu1  ;;  %984 = vmatpush3.msra.mxu1 %v472_v20  ;;  %991 = vmatmul.mubr.msk.f32.vlgmr.msra.gmra.mrb[0].mxu0 %vm497_vm2, %v491_v19 }
 0x15d   : > { %v480_v24 = vadd.f32 %v961_v21, %v455_v23  ;;  %v457_v25 = vpop.f32.mrb[3].mxu1  ;;  %993 = vmatprep.subr.mxu0 %v1287_v0  ;;  %995 = vmatprep.mubr.msk.f32.mxu0 %vm1288_vm1, %v1287_v0 }
 0x15e   : > { %986 = vmatmul.mubr.msk.f32.vlgmr.msra.gmra.mrb[4].mxu1 %vm497_vm2, %v963_v22  ;;  %v488_v27 = vadd.f32 %v962_v26, %v457_v25 }
 0x15f   : > { %994 = vmatpush3.msra.mxu0 %v480_v24 }
 0x160   : > { %998 = vmatprep.subr.mxu0 %v1287_v0 }
 0x164   : > { %996 = vmatmul.mubr.msk.f32.vlgmr.msra.gmra.mrb[0].mxu0 %vm497_vm2, %v966_v28 }
 0x165   : > { %999 = vmatpush3.msra.mxu0 %v488_v27  ;;  %1000 = vmatprep.mubr.msk.f32.mxu0 %vm1288_vm1, %v1287_v0 }
 0x16c   : > { %1001 = vmatmul.mubr.msk.f32.vlgmr.msra.gmra.mrb[0].mxu0 %vm497_vm2, %v968_v29 }
 0x231   : > { %v567_v30 = vpop.f32.mrb[4].mxu1 }
 0x232   : > { %v987_v31 = vpop.f32.mrb[5].mxu1 }
 0x23f   : > { %v795_v32 = vpop.f32.mrb[0].mxu0 }
 0x240   : > { %v1011_v33 = vadd.f32 %v795_v32, %v567_v30  ;;  %v1002_v34 = vpop.f32.mrb[1].mxu0 }
 0x242   : > { %800 = vst [vmem:[%s296_s6] sm:$0xff] %v1011_v33 }
 0x243   : > { %1201 = shalt.err (!%p1198_p11)
}
 0x244   : > { %s1202_s27 = scalar_lea.hbm %s1549_s13, 128  ;;  %s1206_s21 = scalar_lea.hbm %s1602_s4, 256 }
 0x245   : > { %p1203_p12 = scmp.ne.s32.totalorder %s1549_s13, %s1202_s27  ;;  %p1207_p13 = scmp.lt.u32.totalorder %s1549_s13, %s1602_s4 }
 0x246   : > { %p1208_p0 = scmp.lt.u32.totalorder %s1206_s21, %s1202_s27  ;;  %p1210_p9 = scmp.lt.u32.totalorder %s1202_s27, %s1549_s13 }
 0x247   : > { %p1204_p3 = pnand %p1203_p12, %p1407_p10 }
 0x248   : > { %p1209_p5 = por %p1208_p0, %p1207_p13 }
 0x249   : > { %p1205_p6 = pneg %p1204_p3 }
 0x24a   : > { %p1211_p1 = por %p1210_p9, %p1209_p5 }
 0x24c   : > { %p1212_p2 = pnand %p1211_p1, %p1205_p6 }
 0x24e   : > { %1215 = shalt.err (!%p1212_p2)
}
 0x24f   : > { %1024 = dma.vmem_to_hbm [thread:$0]  (%p1407_p10), %s1551_s26, 128, %s1549_s13, %s802_s22  }
 0x250 PF: > { %s828_s5 = sand.u32 1, %s1258_s15   ;;  %p1623_p7 = scmp.ne.s32.totalorder %s1609_s24, 0 }
 0x251   : > { %p1624_p4 = scmp.ge.s32.totalorder %s1278_s20, 2  ;;  %s829_s8 = scalar_lea.sflag [#allocation5], %s828_s5 }
 0x253   : > { %p1038_p8 = pnand %p1624_p4, %p1623_p7 }
 0x255   : > { %1253 = dma.done.wait (!%p1038_p8), %s829_s8, 128  }
 0x256   : > { %1255 = vsyncadd (!%p1038_p8), %s829_s8, 4294967168  ;;  %s23_s20 = sadd.s32 1, %s1278_s20   ;;  %s1625_s15 = smov %s1262_s16 }
 0x257   : > { %p20_p11 = scmp.ge.s32.totalorder %s23_s20, 4   ;;  %s1626_s16 = smov %s1266_s17 }
 0x258   : > { %s1627_s17 = smov %s1419_s7  ;;  %s1628_s18 = smov %s1274_s19 }
 0x259   : > { %s1629_s19 = smov %s1631_s29  ;;  %22 = sbr.rel (!%p20_p11) target bundleno = 11 (0xb), region = 114 }
 0x260   :  { %834 = vsyncpa [#allocation4], 1 }
 0x261   :  { %836 = vsyncpa [#allocation4 + $0x1], 1 }
 0x262   :  { %837 = vsyncpa [#allocation7], 1 }
 0x263   :  { %839 = vsyncpa [#allocation7 + $0x1], 1 }
 0x264   :  { %840 = vsyncpa [#allocation5], 1 }
 0x265   :  { %842 = vsyncpa [#allocation5 + $0x1], 1 }

</bundles_post_ra>
